<compile_context>
chip_gen: v5e
topology: v5e:2x2
jax: 0.10.0
libtpu: 0.0.40
codegen_flags: <defaults>
</compile_context>

<pallas_src>
import functools
import math

import jax
import jax.numpy as jnp
from jax.experimental import pallas as pl
from jax.experimental.pallas import tpu as pltpu


def _layernorm_kernel(x_ref, gamma_ref, beta_ref, o_ref, *, eps, inv_h):
    # x_ref: (tm, Hp) tile of rows; gamma/beta: (1, Hp) f32 broadcast over rows.
    # inv_h = 1 / true_hidden (zero-padded lanes contribute 0 to both sums).
    x = x_ref[...].astype(jnp.float32)
    s = jnp.sum(x, axis=-1, keepdims=True)
    ss = jnp.sum(x * x, axis=-1, keepdims=True)
    mean = s * inv_h
    var = jnp.maximum(ss * inv_h - mean * mean, 0.0)   # unbiased=False, clamp >= 0
    inv = jax.lax.rsqrt(var + eps)
    out = gamma_ref[...] * ((x - mean) * inv) + beta_ref[...]
    o_ref[...] = out.astype(o_ref.dtype)


def _sublane_multiple(dtype) -> int:
    # Minimum row-tile multiple so loads/stores stay unmasked per dtype packing.
    itemsize = jnp.dtype(dtype).itemsize
    return {4: 8, 2: 16, 1: 32}.get(itemsize, 8)


def _tpu_params():
    """(vmem_capacity_bytes, num_tensorcores) with safe fallbacks."""
    vmem_bytes = 128 * 1024 * 1024
    num_cores = 1
    try:
        info = pltpu.get_tpu_info()
        vmem_bytes = int(getattr(info, "vmem_capacity_bytes", vmem_bytes))
        nc = getattr(info, "num_cores", None) or getattr(info, "tensor_cores_per_chip", None)
        if nc:
            num_cores = int(nc)
    except Exception:
        pass
    # v7x-class chips have 64 MiB VMEM per TC and 2 TCs per chip.
    if num_cores <= 1 and vmem_bytes <= 64 * 1024 * 1024:
        num_cores = 2
    return vmem_bytes, num_cores


def _choose_block_rows(rows, hidden, dtype, tile_budget_bytes, max_rows=8192):
    """Pick the row tile from a per-step VMEM budget.

    Per-step footprint per row:
      2 (double buffer) x (input + output tile) in native dtype   = 4*H*itemsize
      + f32 working set from x.astype(f32) and temps (~3 f32 tiles) = 3*H*4
    """
    sub = _sublane_multiple(dtype)
    itemsize = jnp.dtype(dtype).itemsize
    bytes_per_row = 4 * hidden * itemsize + 3 * hidden * 4
    tm = tile_budget_bytes // max(bytes_per_row, 1)
    tm = max(sub, min(tm, max_rows))
    rows_rounded = ((rows + sub - 1) // sub) * sub
    tm = min(tm, rows_rounded)
    tm = max(sub, (tm // sub) * sub)          # multiple of sublane packing
    return int(tm)


def layer_norm(x, gamma, beta, eps=1e-12, *, block_rows=None):
    """x: (..., H); gamma/beta: (H,). Normalizes over the last dim."""
    orig_shape = x.shape
    H = orig_shape[-1]
    rows = math.prod(orig_shape[:-1]) if len(orig_shape) > 1 else 1
    x2 = x.reshape(rows, H)

    # Lane-dense output: pad H up to a multiple of 128 so output stores are
    # full-width vst, not masked partial stores. Zero padding is neutral for
    # the statistics because we divide by the true H, and gamma/beta padding
    # of 0 zeroes the padded output columns (sliced off afterwards).
    LANE = 128
    Hp = ((H + LANE - 1) // LANE) * LANE
    if Hp != H:
        x2 = jnp.pad(x2, ((0, 0), (0, Hp - H)))
        gamma2 = jnp.pad(gamma.astype(jnp.float32), (0, Hp - H)).reshape(1, Hp)
        beta2 = jnp.pad(beta.astype(jnp.float32), (0, Hp - H)).reshape(1, Hp)
    else:
        gamma2 = gamma.astype(jnp.float32).reshape(1, Hp)
        beta2 = beta.astype(jnp.float32).reshape(1, Hp)

    # Generation-aware sizing.
    vmem_bytes, num_cores = _tpu_params()
    if vmem_bytes <= 64 * 1024 * 1024:        # v7x-class: 64 MiB VMEM per TC
        tile_budget = 10 * 1024 * 1024
        vmem_limit = 36 * 1024 * 1024
    else:                                      # v5e / v6e: 128 MiB VMEM
        tile_budget = 24 * 1024 * 1024
        vmem_limit = 64 * 1024 * 1024

    sub = _sublane_multiple(x.dtype)
    if block_rows is not None:
        tm = int(block_rows)
    else:
        tm = _choose_block_rows(rows, Hp, x.dtype, tile_budget)
        # Make sure the "parallel" row axis has enough steps to shard across
        # all TensorCores (v7x megacore) — halve tm until grid >= 2*cores.
        min_steps = 2 * max(num_cores, 1)
        while tm > sub and pl.cdiv(rows, tm) < min_steps:
            tm = max(sub, ((tm // 2) // sub) * sub)

    # Ragged last block is handled by Pallas (masked output stores); per-row
    # normalization means out-of-range rows never contaminate valid rows.
    grid = (pl.cdiv(rows, tm),)

    itemsize = jnp.dtype(x.dtype).itemsize
    cost = pl.CostEstimate(
        flops=9 * rows * Hp,
        transcendentals=rows,
        bytes_accessed=2 * rows * Hp * itemsize + 2 * Hp * 4,
    )

    out = pl.pallas_call(
        functools.partial(_layernorm_kernel, eps=eps, inv_h=1.0 / H),
        out_shape=jax.ShapeDtypeStruct((rows, Hp), x.dtype),
        grid_spec=pltpu.PrefetchScalarGridSpec(
            num_scalar_prefetch=0,
            grid=grid,
            in_specs=[
                pl.BlockSpec((tm, Hp), lambda i: (i, 0)),
                pl.BlockSpec((1, Hp), lambda i: (0, 0)),
                pl.BlockSpec((1, Hp), lambda i: (0, 0)),
            ],
            out_specs=pl.BlockSpec((tm, Hp), lambda i: (i, 0)),
        ),
        compiler_params=pltpu.CompilerParams(
            dimension_semantics=("parallel",),
            vmem_limit_bytes=vmem_limit,
        ),
        cost_estimate=cost,
    )(x2, gamma2, beta2)

    if Hp != H:
        out = out[:, :H]
    return out.reshape(orig_shape)


if __name__ == "__main__":
    key = jax.random.PRNGKey(0)
    batch, seq, hidden = 2, 8, 32
    x = jax.random.normal(key, (batch, seq, hidden), dtype=jnp.float32)

    # Deterministic parameter init matching nn.Parameter(torch.ones/zeros(hidden)).
    gamma = jnp.ones((hidden,), dtype=jnp.float32)
    beta = jnp.zeros((hidden,), dtype=jnp.float32)

    out = layer_norm(x, gamma, beta, eps=1e-12)
    out = jax.block_until_ready(out)

    # Reference check in plain JAX (same semantics as the PyTorch module).
    mean = jnp.mean(x, axis=-1, keepdims=True)
    var = jnp.mean((x - mean) ** 2, axis=-1, keepdims=True)
    ref = gamma * ((x - mean) / jnp.sqrt(var + 1e-12)) + beta
    assert jnp.allclose(out, ref, atol=1e-5, rtol=1e-5), "mismatch vs reference"

    print("KERNEL_OK")
</pallas_src>

<mosaic_0001>
module attributes {stable_mosaic.version = 11 : i64} {
  func.func @_layernorm_kernel(%arg0: i32, %arg1: memref<8x128xf32, #tpu.memory_space<vmem>>, %arg2: memref<1x128xf32, #tpu.memory_space<vmem>>, %arg3: memref<1x128xf32, #tpu.memory_space<vmem>>, %arg4: memref<8x128xf32, #tpu.memory_space<vmem>>) attributes {dimension_semantics = [#tpu.dimension_semantics<parallel>], iteration_bounds = array<i64: 2>, scalar_prefetch = 0 : i64, scratch_operands = 0 : i64, tpu.core_type = #tpu.core_type<tc>, window_params = [{transform_indices = @transform_0, window_bounds = array<i64: 8, 128>}, {pipeline_mode = #tpu.pipeline_mode<synchronous>, transform_indices = @transform_1, window_bounds = array<i64: 1, 128>}, {pipeline_mode = #tpu.pipeline_mode<synchronous>, transform_indices = @transform_2, window_bounds = array<i64: 1, 128>}, {transform_indices = @transform_3, window_bounds = array<i64: 8, 128>}]} {
    %c0 = arith.constant 0 : index
    %c0_0 = arith.constant 0 : index
    %0 = vector.load %arg1[%c0, %c0_0] : memref<8x128xf32, #tpu.memory_space<vmem>>, vector<8x128xf32>
    %cst = arith.constant dense<0.000000e+00> : vector<8xf32>
    %1 = vector.multi_reduction <add>, %0, %cst [1] : vector<8x128xf32> to vector<8xf32>
    %2 = vector.shape_cast %1 : vector<8xf32> to vector<8x1xf32>
    %3 = arith.mulf %0, %0 : vector<8x128xf32>
    %cst_1 = arith.constant dense<0.000000e+00> : vector<8xf32>
    %4 = vector.multi_reduction <add>, %3, %cst_1 [1] : vector<8x128xf32> to vector<8xf32>
    %5 = vector.shape_cast %4 : vector<8xf32> to vector<8x1xf32>
    %cst_2 = arith.constant 3.125000e-02 : f32
    %6 = vector.broadcast %cst_2 : f32 to vector<8x1xf32>
    %7 = arith.mulf %2, %6 : vector<8x1xf32>
    %cst_3 = arith.constant 3.125000e-02 : f32
    %8 = vector.broadcast %cst_3 : f32 to vector<8x1xf32>
    %9 = arith.mulf %5, %8 : vector<8x1xf32>
    %10 = arith.mulf %7, %7 : vector<8x1xf32>
    %11 = arith.subf %9, %10 : vector<8x1xf32>
    %cst_4 = arith.constant 0.000000e+00 : f32
    %12 = vector.broadcast %cst_4 : f32 to vector<8x1xf32>
    %13 = arith.maximumf %11, %12 : vector<8x1xf32>
    %cst_5 = arith.constant 9.99999996E-13 : f32
    %14 = vector.broadcast %cst_5 : f32 to vector<8x1xf32>
    %15 = arith.addf %13, %14 : vector<8x1xf32>
    %16 = math.rsqrt %15 : vector<8x1xf32>
    %c0_6 = arith.constant 0 : index
    %c0_7 = arith.constant 0 : index
    %17 = vector.load %arg2[%c0_6, %c0_7] : memref<1x128xf32, #tpu.memory_space<vmem>>, vector<1x128xf32>
    %18 = vector.broadcast %7 : vector<8x1xf32> to vector<8x128xf32>
    %19 = arith.subf %0, %18 : vector<8x128xf32>
    %20 = vector.broadcast %16 : vector<8x1xf32> to vector<8x128xf32>
    %21 = arith.mulf %19, %20 : vector<8x128xf32>
    %22 = vector.broadcast %17 : vector<1x128xf32> to vector<8x128xf32>
    %23 = arith.mulf %22, %21 : vector<8x128xf32>
    %c0_8 = arith.constant 0 : index
    %c0_9 = arith.constant 0 : index
    %24 = vector.load %arg3[%c0_8, %c0_9] : memref<1x128xf32, #tpu.memory_space<vmem>>, vector<1x128xf32>
    %25 = vector.broadcast %24 : vector<1x128xf32> to vector<8x128xf32>
    %26 = arith.addf %23, %25 : vector<8x128xf32>
    %c0_10 = arith.constant 0 : index
    %c0_11 = arith.constant 0 : index
    %27 = vector.load %arg4[%c0_10, %c0_11] : memref<8x128xf32, #tpu.memory_space<vmem>>, vector<8x128xf32>
    tpu.vector_store %arg4[%c0_10, %c0_11], %26 {strides = array<i32>} : memref<8x128xf32, #tpu.memory_space<vmem>>, vector<8x128xf32>,
    return
  }
  func.func @transform_0(%arg0: i32) -> (i32, i32) {
    %c0_i32 = arith.constant 0 : i32
    %c0_i32_0 = arith.constant 0 : i32
    return %arg0, %c0_i32 : i32, i32
  }
  func.func @transform_1(%arg0: i32) -> (i32, i32) {
    %c0_i32 = arith.constant 0 : i32
    %c0_i32_0 = arith.constant 0 : i32
    %c0_i32_1 = arith.constant 0 : i32
    return %c0_i32, %c0_i32_0 : i32, i32
  }
  func.func @transform_2(%arg0: i32) -> (i32, i32) {
    %c0_i32 = arith.constant 0 : i32
    %c0_i32_0 = arith.constant 0 : i32
    %c0_i32_1 = arith.constant 0 : i32
    return %c0_i32, %c0_i32_0 : i32, i32
  }
  func.func @transform_3(%arg0: i32) -> (i32, i32) {
    %c0_i32 = arith.constant 0 : i32
    %c0_i32_0 = arith.constant 0 : i32
    return %arg0, %c0_i32 : i32, i32
  }
}

</mosaic_0001>

<bundles_post_ra>
// kernel: tpu_custom_call.1
= control target key start
LH: loop header
LB: loop body
LE: loop exit
PB: predicated region body
PF: predicated region fallthrough
CT: control target
= control target key end

     0   :  { %8 = vsyncpa [#allocation3], 0  ;;  %s707_s0 = inlined_call_operand.hbm [shape: f32[16,128], index: 0, kind: input, shape index: {}]   ;;  %s708_s1 = inlined_call_operand.hbm [shape: f32[1,128], index: 1, kind: input, shape index: {}]   ;;  %s709_s2 = inlined_call_operand.vmem [shape: f32[1,128], index: 2, kind: input, shape index: {}]   ;;  %s710_s3 = inlined_call_operand.hbm [shape: f32[16,128], index: 3, kind: output, shape index: {}]  }
   0x1   :  { %10 = vsyncpa [#allocation3 + $0x1], 0 }
   0x2   :  { %11 = vsyncpa [#allocation6], 0 }
   0x3   :  { %12 = vsyncpa [#allocation4], 0 }
   0x4   :  { %14 = vsyncpa [#allocation4 + $0x1], 0  ;;  %s562_s12 = smov 0   ;;  %s564_s13 = smov 0  }
   0x5   :  { %s566_s14 = smov 0   ;;  %s568_s15 = smov 0  }
   0x6 LB: > { %s583_s16 = sadd.s32 4294967295, %s539_s15   ;;  %s334_s17 = sadd.s32 4294967294, %s539_s15   ;;  %s539_s15 = sphi %s568_s15, %s720_s15   ;;  %s535_s14 = sphi %s566_s14, %s719_s14   ;;  %s531_s13 = sphi %s564_s13, %s718_s13   ;;  %s527_s12 = sphi %s562_s12, %s717_s12  }
   0x7   : > { %p40_p0 = scmp.ne.s32.totalorder %s531_s13, %s527_s12  ;;  %p41_p1 = scmp.eq.s32.totalorder %s583_s16, 0 }
   0x8   : > { %p106_p2 = scmp.eq.s32.totalorder %s583_s16, 1  ;;  %p112_p3 = scmp.eq.s32.totalorder %s334_s17, 1 }
   0x9   : > { %p592_p4 = por %p41_p1, %p40_p0  ;;  %p335_p5 = scmp.ge.s32.totalorder %s539_s15, 1 }
   0xa   : > { %p597_p6 = por %p112_p3, %p40_p0  ;;  %p119_p7 = scmp.lt.s32.totalorder %s539_s15, 3 }
   0xb   : > { %s131_s22 = sshll.u32 %s708_s1, 4  ;;  %s541_s24 = smov [#allocation5]   ;;  %s132_s22 = int_to_ptr.hbm [resolvable:$true] %s131_s22 }
   0xc   : > { %p605_p8 = pnand %p335_p5, %p119_p7  ;;  %s133_s25 = sshll.u32 %s541_s24, 4  ;;  %s134_s25 = int_to_ptr.vmem [resolvable:$true] %s133_s25 }
   0xd   : > { %s615_s26 = sadd.s32 1, %s539_s15   ;;  %s27_s27 = sadd.s32 1, %s535_s14 }
   0xe   : > { %p356_p10 = pneg %p605_p8  ;;  %s24_s28 = ssub.s32 %s539_s15, %s615_s26 }
   0xf   : > { %p25_p12 = scmp.eq.s32.totalorder %s24_s28, 0  ;;  %p34_p13 = scmp.ne.s32.totalorder %s535_s14, %s531_s13 }
  0x10   : > { %p357_p11 = pnand %p356_p10, %p41_p1  ;;  %p35_p0 = scmp.eq.s32.totalorder %s539_s15, 0 }
  0x11   : > { %s624_s29 = scalar_select %p25_p12, %s535_s14, %s27_s27  }
  0x12   : > { %359 = dma.hbm_to_vmem [thread:$0]  (!%p357_p11), %s132_s22, 16, %s134_s25, [#allocation6]  }
  0x13   : > { %p628_p3 = por %p106_p2, %p34_p13  ;;  %p369_p5 = scmp.lt.s32.totalorder %s539_s15, 2 }
  0x14   : > { %s147_s4 = sand.u32 1, %s535_s14   ;;  %s339_s5 = sshll.u32 %s539_s15, 3 }
  0x15   : > { %p36_p7 = por %p35_p0, %p34_p13  ;;  %s338_s6 = sshll.u32 %s147_s4, 3 }
  0x16   : > { %s155_s9 = scalar_lea.hbm %s707_s0, %s339_s5  ;;  %s151_s11 = scalar_lea.vmem [#allocation2], %s338_s6 }
  0x17   : > { %s157_s10 = sshll.u32 %s155_s9, 4  ;;  %s159_s17 = sshll.u32 %s151_s11, 4  ;;  %s158_s10 = int_to_ptr.hbm [resolvable:$true] %s157_s10  ;;  %s160_s17 = int_to_ptr.vmem [resolvable:$true] %s159_s17 }
  0x18   : > { %p638_p10 = pnand %p369_p5, %p36_p7  ;;  %s148_s21 = scalar_lea.sflag [#allocation3], %s147_s4 }
  0x19   : > { %s439_s22 = sshra.s32 %s158_s10, 4  ;;  %s446_s28 = scalar_lea.hbm %s707_s0, 16  ;;  %s440_s22 = int_to_ptr.hbm [resolvable:$true] %s439_s22 }
  0x1a   : > { %s441_s24 = scalar_lea.hbm %s440_s22, 8  ;;  %p443_p11 = pneg %p638_p10 }
  0x1b   : > { %p442_p2 = scmp.ne.s32.totalorder %s440_s22, %s441_s24  ;;  %p447_p0 = scmp.lt.s32.totalorder %s440_s22, %s707_s0 }
  0x1c   : > { %p448_p5 = scmp.lt.s32.totalorder %s446_s28, %s441_s24 }
  0x1d   : > { %p444_p12 = pnand %p443_p11, %p442_p2 }
  0x1e   : > { %p449_p7 = por %p448_p5, %p447_p0 }
  0x1f   : > { %p445_p13 = pneg %p444_p12 }
  0x21   : > { %p450_p9 = pnand %p449_p7, %p445_p13 }
  0x23   : > { %453 = shalt.err (!%p450_p9)
}
  0x24   : > { %363 = dma.hbm_to_vmem [thread:$0]  (!%p638_p10), %s158_s10, 128, %s160_s17, %s148_s21  }
  0x25   : > { %168 = sbr.rel (%p605_p8) target bundleno = 205 (0xcd), region = 32  ;;  %s655_s4 = sand.u32 (!%p605_p8), 1, %s531_s13  }
  0x26   : > { %s341_s7 = sshll.u32 (!%p605_p8), %s655_s4, 3  ;;  %s171_s8 = scalar_lea.sflag (!%p605_p8), [#allocation3], %s655_s4 }
  0x27   : > { %s174_s9 = scalar_lea.vmem (!%p605_p8), [#allocation2], %s341_s7 }
  0x2a   : > { %514 = dma.done.wait (%p592_p4), %s171_s8, 128  }
  0x2b   : > { %516 = vsyncadd (%p592_p4), %s171_s8, 4294967168 }
  0x2c   : > { %518 = dma.done.wait (%p41_p1), [#allocation6], 16  }
  0x2d   : > { %520 = vsyncadd (%p41_p1), [#allocation6], 4294967280  ;;  %v203_v0 = vld [vmem:[%s174_s9] sm:$0xff]  ;;  %s345_s18 = sshll.u32 %s583_s16, 3  ;;  %v405_v17 = vld [vmem:[#allocation5] ss:$0 sm:$0xff] }
  0x2e   : > { %204 = vadd.xlane.f32.xlu0 %v203_v0  ;;  %v206_v1 = vmul.f32 %v203_v0, %v203_v0  ;;  %s249_s11 = scalar_lea.hbm %s710_s3, %s345_s18  ;;  %v406_v20 = vld [vmem:[%s709_s2] ss:$0 sm:$0xff]  ;;  %s202_s21 = scalar_lea.vmem [#allocation7], %s341_s7 }
  0x2f   : > { %s251_s16 = sshll.u32 %s202_s21, 4  ;;  %s253_s22 = sshll.u32 %s249_s11, 4  ;;  %s252_s16 = int_to_ptr.vmem [resolvable:$true] %s251_s16  ;;  %s254_s22 = int_to_ptr.hbm [resolvable:$true] %s253_s22 }
  0x30   : > { %s239_s24 = scalar_lea.sflag [#allocation4], %s655_s4  ;;  %s483_s25 = sshra.s32 %s254_s22, 4  ;;  %s484_s25 = int_to_ptr.hbm [resolvable:$true] %s483_s25 }
  0x31   : > { %s485_s27 = scalar_lea.hbm %s484_s25, 8  ;;  %s489_s6 = scalar_lea.hbm %s710_s3, 16 }
  0x32   : > { %p486_p1 = scmp.ne.s32.totalorder %s484_s25, %s485_s27  ;;  %p490_p9 = scmp.lt.s32.totalorder %s484_s25, %s710_s3 }
  0x33   : > { %p491_p10 = scmp.lt.s32.totalorder %s489_s6, %s485_s27 }
  0x34   : > { %p487_p4 = pnand %p486_p1, %p628_p3 }
  0x35   : > { %p492_p2 = por %p491_p10, %p490_p9 }
  0x36   : > { %207 = vadd.xlane.f32.xlu0 %v206_v1  ;;  %p488_p8 = pneg %p487_p4 }
  0x38   : > { %p493_p11 = pnand %p492_p2, %p488_p8 }
  0xa1   : > { %v205_v2 = vpop.xlane.xlu0 %204 }
  0xa2   : > { %v209_v3 = vmul.f32 0.03125, %v205_v2 }
  0xa4   : > { %v211_v5 = vmul.f32 %v209_v3, %v209_v3  ;;  %v226_v16 = vsub.f32 %v203_v0, %v209_v3 }
  0xa9   : > { %v208_v4 = vpop.xlane.xlu0 %207 }
  0xaa   : > { %v210_v6 = vmul.f32 0.03125, %v208_v4 }
  0xac   : > { %v212_v7 = vsub.f32 %v210_v6, %v211_v5 }
  0xae   : > { %v213_v8 = vmax.f32 %v212_v7, 0.0 }
  0xb0   : > { %v214_v9 = vadd.f32 1e-12, %v213_v8 }
  0xb2   : > { %407 = vrsqrt.f32 %v214_v9  ;;  %vm221_vm1 = vweird.f32 %v214_v9 }
  0xb8   : > { %v408_v10 = vpop.eup %407 }
  0xb9   : > { %v216_v11 = vmul.f32 %v408_v10, %v214_v9  ;;  %vm222_vm0 = vweird.f32 %v408_v10 }
  0xba   : > { %vm223_vm2 = vmor %vm221_vm1, %vm222_vm0 }
  0xbb   : > { %v217_v12 = vmul.f32 %v408_v10, %v216_v11 }
  0xbd   : > { %v218_v13 = vmul.f32 0.5, %v217_v12 }
  0xbf   : > { %v219_v14 = vsub.f32 1.5, %v218_v13 }
  0xc1   : > { %v220_v15 = vmul.f32 %v408_v10, %v219_v14 }
  0xc3   : > { %v224_v18 = vsel %vm223_vm2, %v408_v10, %v220_v15 }
  0xc4   : > { %v227_v19 = vmul.f32 %v226_v16, %v224_v18 }
  0xc6   : > { %v231_v21 = vmul.f32 %v405_v17, %v227_v19 }
  0xc8   : > { %v236_v22 = vadd.f32 %v406_v20, %v231_v21 }
  0xca   : > { %237 = vst [vmem:[%s202_s21] sm:$0xff] %v236_v22 }
  0xcb   : > { %496 = shalt.err (!%p493_p11)
}
  0xcc   : > { %354 = dma.vmem_to_hbm [thread:$0]  (%p628_p3), %s252_s16, 128, %s254_s22, %s239_s24  }
  0xcd PF: > { %s265_s4 = sand.u32 1, %s527_s12   ;;  %p716_p12 = scmp.ge.s32.totalorder %s539_s15, 2 }
  0xce   : > { %s266_s9 = scalar_lea.sflag [#allocation4], %s265_s4 }
  0xcf   : > { %p365_p13 = pnand %p716_p12, %p597_p6 }
  0xd1   : > { %p366_p0 = pneg %p365_p13 }
  0xd3   : > { %522 = dma.done.wait (%p366_p0), %s266_s9, 128  }
  0xd4   : > { %524 = vsyncadd (%p366_p0), %s266_s9, 4294967168  ;;  %p17_p5 = scmp.ge.s32.totalorder %s615_s26, 4   ;;  %s717_s12 = smov %s531_s13 }
  0xd5   : > { %s718_s13 = smov %s535_s14  ;;  %s719_s14 = smov %s624_s29 }
  0xd6   : > { %s720_s15 = smov %s615_s26  ;;  %19 = sbr.rel (!%p17_p5) target bundleno = 6 (0x6), region = 81 }
  0xdb   :  { %272 = vsyncpa [#allocation3], 1 }
  0xdc   :  { %274 = vsyncpa [#allocation3 + $0x1], 1 }
  0xdd   :  { %275 = vsyncpa [#allocation6], 1 }
  0xde   :  { %276 = vsyncpa [#allocation4], 1 }
  0xdf   :  { %278 = vsyncpa [#allocation4 + $0x1], 1 }

</bundles_post_ra>
